<compile_context>
chip_gen: v7x
topology: tpu7x:2x2x1
jax: 0.10.0
libtpu: 0.0.40
codegen_flags: <defaults>
</compile_context>

<pallas_src>
import functools

import jax
import jax.numpy as jnp
from jax.experimental import pallas as pl
from jax.experimental.pallas import tpu as pltpu


def _chip_config():
    """Returns (tensorcores_per_chip, use_core_parallel, target_block_bytes)."""
    try:
        kind = jax.devices()[0].device_kind.lower()
    except Exception:
        return 1, False, 4 * 1024 * 1024
    if "v7" in kind:
        return 2, True, 4 * 1024 * 1024            # 2 TCs, CORE_PARALLEL split
    if "v4" in kind or "v5p" in kind:
        return 2, False, 4 * 1024 * 1024           # megacore via PARALLEL
    if "v5 lite" in kind or "v5e" in kind:
        return 1, False, 2 * 1024 * 1024           # smaller blocks on v5e
    return 1, False, 4 * 1024 * 1024               # v6e / unknown single-TC


def _make_kernel(margin, n_valid, lanes, tm, tiles_per_core, unroll, approx):
    margin = float(margin)
    n_chunks = tm // 8

    def kernel(pos_ref, neg_ref, out_ref):
        j = pl.program_id(1)

        @pl.when(j == 0)
        def _():
            out_ref[...] = jnp.zeros_like(out_ref)

        # UNclamped tile id (index_map clamps the DMA; the mask zeroes dup tiles).
        t = pl.program_id(0) * tiles_per_core + j
        row_start = t * tm

        def accumulate(masked):
            zero = jnp.zeros((8, lanes), jnp.float32)

            def body(ch, carry):
                ps, ns, ls = carry
                r0 = pl.multiple_of(ch * 8, 8)
                p = pos_ref[pl.ds(r0, 8), :].astype(jnp.float32)
                n = neg_ref[pl.ds(r0, 8), :].astype(jnp.float32)
                d = p + margin
                if approx:
                    # EUP reciprocal: ~1e-3..1e-4 rel error; off by default.
                    l = jnp.maximum(1.0 - n * pl.reciprocal(d, approx=True), 0.0)
                else:
                    l = jnp.maximum(1.0 - n / d, 0.0)
                if masked:
                    # Flat-element validity mask, only on the boundary tile.
                    rows = (row_start + r0
                            + jax.lax.broadcasted_iota(jnp.int32, (8, 1), 0))
                    cols = jax.lax.broadcasted_iota(jnp.int32, (1, lanes), 1)
                    valid = rows * lanes + cols < n_valid
                    p = jnp.where(valid, p, 0.0)
                    n = jnp.where(valid, n, 0.0)
                    l = jnp.where(valid, l, 0.0)
                return ps + p, ns + n, ls + l

            ps, ns, ls = jax.lax.fori_loop(
                0, n_chunks, body, (zero, zero, zero), unroll=unroll)
            out_ref[0, 0] += ps
            out_ref[0, 1] += ns
            out_ref[0, 2] += ls

        fully_valid = (row_start + tm) * lanes <= n_valid

        @pl.when(fully_valid)           # steady-state fast path: no mask work
        def _():
            accumulate(False)

        @pl.when(jnp.logical_not(fully_valid))   # single boundary / OOB tile
        def _():
            accumulate(True)

    return kernel


@functools.partial(jax.jit, static_argnames=("margin", "lanes", "tm", "approx"))
def triplet_loss_distance(positive_distance, negative_distance, margin=0.01,
                          lanes=None, tm=None, approx=False):
    """Returns (mean(pos), mean(neg), mean(loss)) as f32 scalars."""
    assert positive_distance.shape == negative_distance.shape
    pos = positive_distance.reshape(-1)
    neg = negative_distance.reshape(-1)
    total = pos.shape[0]
    assert total > 0

    num_cores, use_core_parallel, target_bytes = _chip_config()

    # ---- canonical lane-dense layout (rows, L), L a multiple of 128 --------
    if lanes is None:
        L = None
        for cand in (512, 256, 128):
            if total % cand == 0:
                L = cand
                break
        if L is None:
            L = 512          # ragged element count: pad flat tail, mask in-kernel
    else:
        assert lanes % 128 == 0
        L = lanes
    rows = pl.cdiv(total, L)
    padded = rows * L
    if padded != total:
        pos = jnp.pad(pos, (0, padded - total))
        neg = jnp.pad(neg, (0, padded - total))
    pos = pos.reshape(rows, L)
    neg = neg.reshape(rows, L)

    itemsize = jnp.dtype(pos.dtype).itemsize
    sublane = max(8, 32 // itemsize)     # 8 f32 / 16 bf16 / 32 int8

    # ---- row-tile size: ~target_bytes of native-dtype data per input block --
    if tm is None:
        tm = max(sublane, (target_bytes // (L * itemsize)) // sublane * sublane)
    tm = max(sublane, (tm // sublane) * sublane)
    rows_rounded = pl.cdiv(rows, sublane) * sublane
    tm = min(tm, rows_rounded)

    total_tiles = pl.cdiv(rows, tm)
    num_cores = max(1, min(num_cores, total_tiles))
    tiles_per_core = pl.cdiv(total_tiles, num_cores)

    n_chunks = tm // 8
    unroll = n_chunks if n_chunks <= 8 else 8

    kernel = _make_kernel(margin, total, L, tm, tiles_per_core, unroll, approx)

    def in_map(c, j):
        t = c * tiles_per_core + j
        # Clamp fully out-of-range duplicate tiles (odd tile counts across
        # cores); the in-kernel flat-index mask zeroes their contribution.
        return (jnp.minimum(t, total_tiles - 1), 0)

    if num_cores > 1:
        lead_sem = pltpu.CORE_PARALLEL if use_core_parallel else pltpu.PARALLEL
    else:
        lead_sem = pltpu.ARBITRARY

    # Explicit VMEM budget: 2 inputs x 2 pipeline buffers x block + outputs.
    in_block_bytes = tm * L * itemsize
    out_block_bytes = 3 * 8 * L * 4
    vmem_limit = 2 * 2 * in_block_bytes + 2 * out_block_bytes + (2 << 20)
    vmem_limit = int(min(max(vmem_limit, 16 << 20), 48 << 20))

    partials = pl.pallas_call(
        kernel,
        out_shape=jax.ShapeDtypeStruct((num_cores, 3, 8, L), jnp.float32),
        grid_spec=pltpu.PrefetchScalarGridSpec(
            num_scalar_prefetch=0,
            grid=(num_cores, tiles_per_core),
            in_specs=[
                pl.BlockSpec((tm, L), in_map),
                pl.BlockSpec((tm, L), in_map),
            ],
            out_specs=pl.BlockSpec((1, 3, 8, L), lambda c, j: (c, 0, 0, 0)),
        ),
        compiler_params=pltpu.CompilerParams(
            dimension_semantics=(lead_sem, pltpu.ARBITRARY),
            vmem_limit_bytes=vmem_limit,
        ),
    )(pos, neg)

    sums = jnp.sum(partials, axis=(0, 2, 3))   # (3,) — tiny XLA-side final reduce
    inv_n = 1.0 / float(total)
    return sums[0] * inv_n, sums[1] * inv_n, sums[2] * inv_n


def _reference(pos, neg, margin=0.01):
    loss = jnp.maximum(1.0 - neg / (pos + margin), 0.0)
    return jnp.mean(pos), jnp.mean(neg), jnp.mean(loss)


if __name__ == "__main__":
    key = jax.random.PRNGKey(0)
    k1, k2, k3, k4, k5, k6 = jax.random.split(key, 6)

    # Case 1: aligned f32 (distances are non-negative).
    p1 = jnp.abs(jax.random.normal(k1, (16, 128), jnp.float32)) + 0.05
    n1 = jnp.abs(jax.random.normal(k2, (16, 128), jnp.float32)) + 0.05
    got1 = triplet_loss_distance(p1, n1, margin=0.01)
    jax.block_until_ready(got1)
    ref1 = _reference(p1, n1, 0.01)
    for g, r in zip(got1, ref1):
        assert jnp.allclose(g, r, rtol=1e-5, atol=1e-5), (g, r)

    # Case 2: ragged row count + bf16 inputs (kernel reads native dtype,
    # accumulates in f32).
    p2 = (jnp.abs(jax.random.normal(k3, (50, 128), jnp.float32)) + 0.05).astype(jnp.bfloat16)
    n2 = (jnp.abs(jax.random.normal(k4, (50, 128), jnp.float32)) + 0.05).astype(jnp.bfloat16)
    got2 = triplet_loss_distance(p2, n2, margin=0.01)
    jax.block_until_ready(got2)
    ref2 = _reference(p2.astype(jnp.float32), n2.astype(jnp.float32), 0.01)
    for g, r in zip(got2, ref2):
        assert jnp.allclose(g, r, rtol=1e-4, atol=1e-4), (g, r)

    # Case 3: element count not a multiple of 128 (exercises pad + boundary mask).
    p3 = jnp.abs(jax.random.normal(k5, (3, 37), jnp.float32)) + 0.05
    n3 = jnp.abs(jax.random.normal(k6, (3, 37), jnp.float32)) + 0.05
    got3 = triplet_loss_distance(p3, n3, margin=0.01)
    jax.block_until_ready(got3)
    ref3 = _reference(p3, n3, 0.01)
    for g, r in zip(got3, ref3):
        assert jnp.allclose(g, r, rtol=1e-5, atol=1e-5), (g, r)

    print("KERNEL_OK")
</pallas_src>

<mosaic_0001>
module attributes {stable_mosaic.version = 11 : i64} {
  func.func @kernel(%arg0: i32, %arg1: i32, %arg2: memref<8x512xf32, #tpu.memory_space<vmem>>, %arg3: memref<8x512xf32, #tpu.memory_space<vmem>>, %arg4: memref<1x3x8x512xf32, #tpu.memory_space<vmem>>) attributes {dimension_semantics = [#tpu.dimension_semantics<arbitrary>, #tpu.dimension_semantics<arbitrary>], iteration_bounds = array<i64: 1, 1>, scalar_prefetch = 0 : i64, scratch_operands = 0 : i64, tpu.core_type = #tpu.core_type<tc>, window_params = [{transform_indices = @transform_0, window_bounds = array<i64: 8, 512>}, {transform_indices = @transform_1, window_bounds = array<i64: 8, 512>}, {transform_indices = @transform_2, window_bounds = array<i64: 1, 3, 8, 512>}]} {
    %c0_i32 = arith.constant 0 : i32
    %0 = arith.cmpi eq, %arg1, %c0_i32 : i32
    %1 = arith.extui %0 : i1 to i32
    %c0_i32_0 = arith.constant 0 : i32
    %2 = arith.cmpi ne, %1, %c0_i32_0 : i32
    scf.if %2 {
      %cst = arith.constant 0.000000e+00 : f32
      %14 = vector.broadcast %cst : f32 to vector<1x3x8x512xf32>
      %c0 = arith.constant 0 : index
      %c0_4 = arith.constant 0 : index
      %c0_5 = arith.constant 0 : index
      %c0_6 = arith.constant 0 : index
      %15 = vector.load %arg4[%c0, %c0_4, %c0_5, %c0_6] : memref<1x3x8x512xf32, #tpu.memory_space<vmem>>, vector<1x3x8x512xf32>
      tpu.vector_store %arg4[%c0, %c0_4, %c0_5, %c0_6], %14 {strides = array<i32>} : memref<1x3x8x512xf32, #tpu.memory_space<vmem>>, vector<1x3x8x512xf32>,
    } else {
    }
    %c1_i32 = arith.constant 1 : i32
    %3 = arith.muli %arg0, %c1_i32 : i32
    %4 = arith.addi %3, %arg1 : i32
    %c8_i32 = arith.constant 8 : i32
    %5 = arith.muli %4, %c8_i32 : i32
    %c8_i32_1 = arith.constant 8 : i32
    %6 = arith.addi %5, %c8_i32_1 : i32
    %c512_i32 = arith.constant 512 : i32
    %7 = arith.muli %6, %c512_i32 : i32
    %c2048_i32 = arith.constant 2048 : i32
    %8 = arith.cmpi sle, %7, %c2048_i32 : i32
    %9 = arith.extui %8 : i1 to i32
    %c0_i32_2 = arith.constant 0 : i32
    %10 = arith.cmpi ne, %9, %c0_i32_2 : i32
    scf.if %10 {
      %cst = arith.constant 0.000000e+00 : f32
      %14 = vector.broadcast %cst : f32 to vector<8x512xf32>
      %c0_i32_4 = arith.constant 0 : i32
      %c8_i32_5 = arith.constant 8 : i32
      %15 = arith.muli %c0_i32_4, %c8_i32_5 : i32
      %16 = tpu.assume_multiple %15, 8 : i32
      %17 = arith.index_cast %16 : i32 to index
      %c0 = arith.constant 0 : index
      %18 = vector.load %arg2[%17, %c0] : memref<8x512xf32, #tpu.memory_space<vmem>>, vector<8x512xf32>
      %19 = arith.index_cast %16 : i32 to index
      %c0_6 = arith.constant 0 : index
      %20 = vector.load %arg3[%19, %c0_6] : memref<8x512xf32, #tpu.memory_space<vmem>>, vector<8x512xf32>
      %cst_7 = arith.constant 0.00999999977 : f32
      %21 = vector.broadcast %cst_7 : f32 to vector<8x512xf32>
      %22 = arith.addf %18, %21 : vector<8x512xf32>
      %23 = arith.divf %20, %22 : vector<8x512xf32>
      %cst_8 = arith.constant 1.000000e+00 : f32
      %24 = vector.broadcast %cst_8 : f32 to vector<8x512xf32>
      %25 = arith.subf %24, %23 : vector<8x512xf32>
      %cst_9 = arith.constant 0.000000e+00 : f32
      %26 = vector.broadcast %cst_9 : f32 to vector<8x512xf32>
      %27 = arith.maximumf %25, %26 : vector<8x512xf32>
      %28 = arith.addf %14, %18 : vector<8x512xf32>
      %29 = arith.addf %14, %20 : vector<8x512xf32>
      %30 = arith.addf %14, %27 : vector<8x512xf32>
      %c1_i32_10 = arith.constant 1 : i32
      %c0_11 = arith.constant 0 : index
      %c0_12 = arith.constant 0 : index
      %c0_13 = arith.constant 0 : index
      %c0_14 = arith.constant 0 : index
      %31 = vector.load %arg4[%c0_11, %c0_12, %c0_13, %c0_14] : memref<1x3x8x512xf32, #tpu.memory_space<vmem>>, vector<1x1x8x512xf32>
      %32 = vector.shape_cast %31 : vector<1x1x8x512xf32> to vector<8x512xf32>
      %33 = arith.addf %32, %28 : vector<8x512xf32>
      %c0_15 = arith.constant 0 : index
      %c0_16 = arith.constant 0 : index
      %c0_17 = arith.constant 0 : index
      %c0_18 = arith.constant 0 : index
      %34 = vector.load %arg4[%c0_15, %c0_16, %c0_17, %c0_18] : memref<1x3x8x512xf32, #tpu.memory_space<vmem>>, vector<1x1x8x512xf32>
      %35 = vector.shape_cast %34 : vector<1x1x8x512xf32> to vector<8x512xf32>
      %36 = vector.shape_cast %33 : vector<8x512xf32> to vector<1x1x8x512xf32>
      tpu.vector_store %arg4[%c0_15, %c0_16, %c0_17, %c0_18], %36 {strides = array<i32>} : memref<1x3x8x512xf32, #tpu.memory_space<vmem>>, vector<1x1x8x512xf32>,
      %c0_19 = arith.constant 0 : index
      %c1 = arith.constant 1 : index
      %c0_20 = arith.constant 0 : index
      %c0_21 = arith.constant 0 : index
      %37 = vector.load %arg4[%c0_19, %c1, %c0_20, %c0_21] : memref<1x3x8x512xf32, #tpu.memory_space<vmem>>, vector<1x1x8x512xf32>
      %38 = vector.shape_cast %37 : vector<1x1x8x512xf32> to vector<8x512xf32>
      %39 = arith.addf %38, %29 : vector<8x512xf32>
      %c0_22 = arith.constant 0 : index
      %c1_23 = arith.constant 1 : index
      %c0_24 = arith.constant 0 : index
      %c0_25 = arith.constant 0 : index
      %40 = vector.load %arg4[%c0_22, %c1_23, %c0_24, %c0_25] : memref<1x3x8x512xf32, #tpu.memory_space<vmem>>, vector<1x1x8x512xf32>
      %41 = vector.shape_cast %40 : vector<1x1x8x512xf32> to vector<8x512xf32>
      %42 = vector.shape_cast %39 : vector<8x512xf32> to vector<1x1x8x512xf32>
      tpu.vector_store %arg4[%c0_22, %c1_23, %c0_24, %c0_25], %42 {strides = array<i32>} : memref<1x3x8x512xf32, #tpu.memory_space<vmem>>, vector<1x1x8x512xf32>,
      %c0_26 = arith.constant 0 : index
      %c2 = arith.constant 2 : index
      %c0_27 = arith.constant 0 : index
      %c0_28 = arith.constant 0 : index
      %43 = vector.load %arg4[%c0_26, %c2, %c0_27, %c0_28] : memref<1x3x8x512xf32, #tpu.memory_space<vmem>>, vector<1x1x8x512xf32>
      %44 = vector.shape_cast %43 : vector<1x1x8x512xf32> to vector<8x512xf32>
      %45 = arith.addf %44, %30 : vector<8x512xf32>
      %c0_29 = arith.constant 0 : index
      %c2_30 = arith.constant 2 : index
      %c0_31 = arith.constant 0 : index
      %c0_32 = arith.constant 0 : index
      %46 = vector.load %arg4[%c0_29, %c2_30, %c0_31, %c0_32] : memref<1x3x8x512xf32, #tpu.memory_space<vmem>>, vector<1x1x8x512xf32>
      %47 = vector.shape_cast %46 : vector<1x1x8x512xf32> to vector<8x512xf32>
      %48 = vector.shape_cast %45 : vector<8x512xf32> to vector<1x1x8x512xf32>
      tpu.vector_store %arg4[%c0_29, %c2_30, %c0_31, %c0_32], %48 {strides = array<i32>} : memref<1x3x8x512xf32, #tpu.memory_space<vmem>>, vector<1x1x8x512xf32>,
    } else {
    }
    %true = arith.constant true
    %11 = arith.xori %8, %true : i1
    %12 = arith.extui %11 : i1 to i32
    %c0_i32_3 = arith.constant 0 : i32
    %13 = arith.cmpi ne, %12, %c0_i32_3 : i32
    scf.if %13 {
      %cst = arith.constant 0.000000e+00 : f32
      %14 = vector.broadcast %cst : f32 to vector<8x512xf32>
      %c0_i32_4 = arith.constant 0 : i32
      %c8_i32_5 = arith.constant 8 : i32
      %15 = arith.muli %c0_i32_4, %c8_i32_5 : i32
      %16 = tpu.assume_multiple %15, 8 : i32
      %17 = arith.index_cast %16 : i32 to index
      %c0 = arith.constant 0 : index
      %18 = vector.load %arg2[%17, %c0] : memref<8x512xf32, #tpu.memory_space<vmem>>, vector<8x512xf32>
      %19 = arith.index_cast %16 : i32 to index
      %c0_6 = arith.constant 0 : index
      %20 = vector.load %arg3[%19, %c0_6] : memref<8x512xf32, #tpu.memory_space<vmem>>, vector<8x512xf32>
      %cst_7 = arith.constant 0.00999999977 : f32
      %21 = vector.broadcast %cst_7 : f32 to vector<8x512xf32>
      %22 = arith.addf %18, %21 : vector<8x512xf32>
      %23 = arith.divf %20, %22 : vector<8x512xf32>
      %cst_8 = arith.constant 1.000000e+00 : f32
      %24 = vector.broadcast %cst_8 : f32 to vector<8x512xf32>
      %25 = arith.subf %24, %23 : vector<8x512xf32>
      %cst_9 = arith.constant 0.000000e+00 : f32
      %26 = vector.broadcast %cst_9 : f32 to vector<8x512xf32>
      %27 = arith.maximumf %25, %26 : vector<8x512xf32>
      %28 = arith.addi %5, %16 : i32
      %29 = tpu.iota {dimensions = array<i32: 0>} : vector<8x1xi32>
      %30 = vector.broadcast %28 : i32 to vector<8x1xi32>
      %31 = arith.addi %30, %29 : vector<8x1xi32>
      %32 = tpu.iota {dimensions = array<i32: 1>} : vector<1x512xi32>
      %c512_i32_10 = arith.constant 512 : i32
      %33 = vector.broadcast %c512_i32_10 : i32 to vector<8x1xi32>
      %34 = arith.muli %31, %33 : vector<8x1xi32>
      %35 = vector.broadcast %34 : vector<8x1xi32> to vector<8x512xi32>
      %36 = vector.broadcast %32 : vector<1x512xi32> to vector<8x512xi32>
      %37 = arith.addi %35, %36 : vector<8x512xi32>
      %c2048_i32_11 = arith.constant 2048 : i32
      %38 = vector.broadcast %c2048_i32_11 : i32 to vector<8x512xi32>
      %39 = arith.cmpi slt, %37, %38 : vector<8x512xi32>
      %cst_12 = arith.constant 0.000000e+00 : f32
      %40 = vector.broadcast %cst_12 : f32 to vector<8x512xf32>
      %41 = arith.select %39, %18, %40 : vector<8x512xi1>, vector<8x512xf32>
      %cst_13 = arith.constant 0.000000e+00 : f32
      %42 = vector.broadcast %cst_13 : f32 to vector<8x512xf32>
      %43 = arith.select %39, %20, %42 : vector<8x512xi1>, vector<8x512xf32>
      %cst_14 = arith.constant 0.000000e+00 : f32
      %44 = vector.broadcast %cst_14 : f32 to vector<8x512xf32>
      %45 = arith.select %39, %27, %44 : vector<8x512xi1>, vector<8x512xf32>
      %46 = arith.addf %14, %41 : vector<8x512xf32>
      %47 = arith.addf %14, %43 : vector<8x512xf32>
      %48 = arith.addf %14, %45 : vector<8x512xf32>
      %c1_i32_15 = arith.constant 1 : i32
      %c0_16 = arith.constant 0 : index
      %c0_17 = arith.constant 0 : index
      %c0_18 = arith.constant 0 : index
      %c0_19 = arith.constant 0 : index
      %49 = vector.load %arg4[%c0_16, %c0_17, %c0_18, %c0_19] : memref<1x3x8x512xf32, #tpu.memory_space<vmem>>, vector<1x1x8x512xf32>
      %50 = vector.shape_cast %49 : vector<1x1x8x512xf32> to vector<8x512xf32>
      %51 = arith.addf %50, %46 : vector<8x512xf32>
      %c0_20 = arith.constant 0 : index
      %c0_21 = arith.constant 0 : index
      %c0_22 = arith.constant 0 : index
      %c0_23 = arith.constant 0 : index
      %52 = vector.load %arg4[%c0_20, %c0_21, %c0_22, %c0_23] : memref<1x3x8x512xf32, #tpu.memory_space<vmem>>, vector<1x1x8x512xf32>
      %53 = vector.shape_cast %52 : vector<1x1x8x512xf32> to vector<8x512xf32>
      %54 = vector.shape_cast %51 : vector<8x512xf32> to vector<1x1x8x512xf32>
      tpu.vector_store %arg4[%c0_20, %c0_21, %c0_22, %c0_23], %54 {strides = array<i32>} : memref<1x3x8x512xf32, #tpu.memory_space<vmem>>, vector<1x1x8x512xf32>,
      %c0_24 = arith.constant 0 : index
      %c1 = arith.constant 1 : index
      %c0_25 = arith.constant 0 : index
      %c0_26 = arith.constant 0 : index
      %55 = vector.load %arg4[%c0_24, %c1, %c0_25, %c0_26] : memref<1x3x8x512xf32, #tpu.memory_space<vmem>>, vector<1x1x8x512xf32>
      %56 = vector.shape_cast %55 : vector<1x1x8x512xf32> to vector<8x512xf32>
      %57 = arith.addf %56, %47 : vector<8x512xf32>
      %c0_27 = arith.constant 0 : index
      %c1_28 = arith.constant 1 : index
      %c0_29 = arith.constant 0 : index
      %c0_30 = arith.constant 0 : index
      %58 = vector.load %arg4[%c0_27, %c1_28, %c0_29, %c0_30] : memref<1x3x8x512xf32, #tpu.memory_space<vmem>>, vector<1x1x8x512xf32>
      %59 = vector.shape_cast %58 : vector<1x1x8x512xf32> to vector<8x512xf32>
      %60 = vector.shape_cast %57 : vector<8x512xf32> to vector<1x1x8x512xf32>
      tpu.vector_store %arg4[%c0_27, %c1_28, %c0_29, %c0_30], %60 {strides = array<i32>} : memref<1x3x8x512xf32, #tpu.memory_space<vmem>>, vector<1x1x8x512xf32>,
      %c0_31 = arith.constant 0 : index
      %c2 = arith.constant 2 : index
      %c0_32 = arith.constant 0 : index
      %c0_33 = arith.constant 0 : index
      %61 = vector.load %arg4[%c0_31, %c2, %c0_32, %c0_33] : memref<1x3x8x512xf32, #tpu.memory_space<vmem>>, vector<1x1x8x512xf32>
      %62 = vector.shape_cast %61 : vector<1x1x8x512xf32> to vector<8x512xf32>
      %63 = arith.addf %62, %48 : vector<8x512xf32>
      %c0_34 = arith.constant 0 : index
      %c2_35 = arith.constant 2 : index
      %c0_36 = arith.constant 0 : index
      %c0_37 = arith.constant 0 : index
      %64 = vector.load %arg4[%c0_34, %c2_35, %c0_36, %c0_37] : memref<1x3x8x512xf32, #tpu.memory_space<vmem>>, vector<1x1x8x512xf32>
      %65 = vector.shape_cast %64 : vector<1x1x8x512xf32> to vector<8x512xf32>
      %66 = vector.shape_cast %63 : vector<8x512xf32> to vector<1x1x8x512xf32>
      tpu.vector_store %arg4[%c0_34, %c2_35, %c0_36, %c0_37], %66 {strides = array<i32>} : memref<1x3x8x512xf32, #tpu.memory_space<vmem>>, vector<1x1x8x512xf32>,
    } else {
    }
    return
  }
  func.func @transform_0(%arg0: i32, %arg1: i32) -> (i32, i32) {
    %c1_i32 = arith.constant 1 : i32
    %0 = arith.muli %arg0, %c1_i32 : i32
    %1 = arith.addi %0, %arg1 : i32
    %c0_i32 = arith.constant 0 : i32
    %2 = arith.minsi %1, %c0_i32 : i32
    %c0_i32_0 = arith.constant 0 : i32
    %c0_i32_1 = arith.constant 0 : i32
    return %2, %c0_i32_0 : i32, i32
  }
  func.func @transform_1(%arg0: i32, %arg1: i32) -> (i32, i32) {
    %c1_i32 = arith.constant 1 : i32
    %0 = arith.muli %arg0, %c1_i32 : i32
    %1 = arith.addi %0, %arg1 : i32
    %c0_i32 = arith.constant 0 : i32
    %2 = arith.minsi %1, %c0_i32 : i32
    %c0_i32_0 = arith.constant 0 : i32
    %c0_i32_1 = arith.constant 0 : i32
    return %2, %c0_i32_0 : i32, i32
  }
  func.func @transform_2(%arg0: i32, %arg1: i32) -> (i32, i32, i32, i32) {
    %c0_i32 = arith.constant 0 : i32
    %c0_i32_0 = arith.constant 0 : i32
    %c0_i32_1 = arith.constant 0 : i32
    %c0_i32_2 = arith.constant 0 : i32
    return %arg0, %c0_i32, %c0_i32_0, %c0_i32_1 : i32, i32, i32, i32
  }
}

</mosaic_0001>

<bundles_post_ra>
// kernel: triplet_loss_distance.1
= control target key start
LH: loop header
LB: loop body
LE: loop exit
PB: predicated region body
PF: predicated region fallthrough
CT: control target
= control target key end

     0   :  { %v292_v0 = vlaneseq  ;;  %s560_s0 = inlined_call_operand.vmem [shape: f32[4,512], index: 0, kind: input, shape index: {}]   ;;  %s561_s1 = inlined_call_operand.vmem [shape: f32[4,512], index: 1, kind: input, shape index: {}]   ;;  %s562_s2 = inlined_call_operand.vmem [shape: f32[1,3,8,512], index: 2, kind: output, shape index: {}]  }
   0x1   :  { %v261_v1 = vld [vmem:[%s560_s0] sm:$0xff]  ;;  %v263_v2 = vld [vmem:[%s560_s0 + $0x10] sm:$0xff]  ;;  %v262_v3 = vld [vmem:[%s560_s0 + $0x8] sm:$0xff] }
   0x2   :  { %v271_v4 = vadd.f32 0.01, %v261_v1  ;;  %v273_v5 = vadd.f32 0.01, %v263_v2  ;;  %v293_v6 = vshrl.u32 %v292_v0, 7  ;;  %v297_v7 = vand.u32 127, %v292_v0 }
   0x3   :  { %v314_v8 = vcombine.low %v261_v1, %v263_v2  ;;  %v315_v9 = vcombine.high %v261_v1, %v263_v2  ;;  %v264_v10 = vld [vmem:[%s560_s0 + $0x18] sm:$0xff]  ;;  %v272_v11 = vadd.f32 0.01, %v262_v3  ;;  %v267_v21 = vld [vmem:[%s561_s1] sm:$0xff]  ;;  %v269_v22 = vld [vmem:[%s561_s1 + $0x10] sm:$0xff] }
   0x4   :  { %465 = vrcp.f32 %v271_v4  ;;  %v301_v12 = vmul.u32 512, %v293_v6  ;;  %v298_v13 = vadd.s32 128, %v297_v7  ;;  %v274_v14 = vadd.f32 0.01, %v264_v10  ;;  %v268_v26 = vld [vmem:[%s561_s1 + $0x8] sm:$0xff]  ;;  %v270_v27 = vld [vmem:[%s561_s1 + $0x18] sm:$0xff] }
   0x5   :  { %467 = vrcp.f32 %v273_v5  ;;  %v299_v15 = vadd.s32 256, %v297_v7  ;;  %v316_v16 = vcombine.low %v262_v3, %v264_v10  ;;  %v300_v17 = vadd.s32 384, %v297_v7 }
   0x6   :  { %v302_v18 = vadd.s32 %v301_v12, %v297_v7  ;;  %v303_v19 = vadd.s32 %v301_v12, %v298_v13  ;;  %469 = vrcp.f32 %v272_v11  ;;  %v317_v20 = vcombine.high %v262_v3, %v264_v10 }
   0x7   :  { %471 = vrcp.f32 %v274_v14  ;;  %v304_v23 = vadd.s32 %v301_v12, %v299_v15  ;;  %v305_v24 = vadd.s32 %v301_v12, %v300_v17  ;;  %v330_v25 = vcombine.low %v267_v21, %v269_v22 }
   0x8   :  { %vm306_vm0 = vcmp.lt.s32.totalorder %v302_v18, 2048  ;;  %vm307_vm1 = vcmp.lt.s32.totalorder %v303_v19, 2048  ;;  %v331_v28 = vcombine.high %v267_v21, %v269_v22  ;;  %v332_v29 = vcombine.low %v268_v26, %v270_v27 }
   0x9   :  { %v322_v30 = vsel %vm306_vm0, %v314_v8, 0.0  ;;  %v323_v31 = vsel %vm307_vm1, %v315_v9, 0.0  ;;  %vm308_vm2 = vcmp.lt.s32.totalorder %v304_v23, 2048  ;;  %vm309_vm3 = vcmp.lt.s32.totalorder %v305_v24, 2048 }
   0xa   :  { %v324_v32 = vsel %vm308_vm2, %v316_v16, 0.0  ;;  %v325_v33 = vsel %vm309_vm3, %v317_v20, 0.0  ;;  %v338_v34 = vsel %vm306_vm0, %v330_v25, 0.0  ;;  %v339_v35 = vsel %vm307_vm1, %v331_v28, 0.0  ;;  %378 = vst [vmem:[%s562_s2] sm:$0xff] %v322_v30  ;;  %379 = vst [vmem:[%s562_s2 + $0x8] sm:$0xff] %v323_v31 }
   0xb   :  { %v340_v36 = vsel %vm308_vm2, %v332_v29, 0.0  ;;  %v333_v37 = vcombine.high %v268_v26, %v270_v27  ;;  %380 = vst [vmem:[%s562_s2 + $0x10] sm:$0xff] %v324_v32  ;;  %381 = vst [vmem:[%s562_s2 + $0x18] sm:$0xff] %v325_v33 }
   0xc   :  { %444 = vst [vmem:[%s562_s2 + $0x20] sm:$0xff] %v338_v34  ;;  %445 = vst [vmem:[%s562_s2 + $0x28] sm:$0xff] %v339_v35 }
   0xd   :  { %v341_v39 = vsel %vm309_vm3, %v333_v37, 0.0  ;;  %446 = vst [vmem:[%s562_s2 + $0x30] sm:$0xff] %v340_v36 }
   0xe   :  { %v466_v38 = vpop.eup %465  ;;  %447 = vst [vmem:[%s562_s2 + $0x38] sm:$0xff] %v341_v39 }
   0xf   :  { %v468_v40 = vpop.eup %467  ;;  %v276_v41 = vmul.f32 %v466_v38, %v267_v21 }
  0x10   :  { %v470_v42 = vpop.eup %469  ;;  %v280_v43 = vmul.f32 %v468_v40, %v269_v22 }
  0x11   :  { %v472_v44 = vpop.eup %471  ;;  %v283_v45 = vsub.f32 1.0, %v276_v41  ;;  %v278_v46 = vmul.f32 %v470_v42, %v268_v26 }
  0x12   :  { %v285_v47 = vsub.f32 1.0, %v280_v43  ;;  %v282_v48 = vmul.f32 %v472_v44, %v270_v27 }
  0x13   :  { %v287_v49 = vmax.f32 %v283_v45, 0.0  ;;  %v284_v50 = vsub.f32 1.0, %v278_v46 }
  0x14   :  { %v289_v51 = vmax.f32 %v285_v47, 0.0  ;;  %v286_v52 = vsub.f32 1.0, %v282_v48 }
  0x15   :  { %v288_v53 = vmax.f32 %v284_v50, 0.0 }
  0x16   :  { %v346_v54 = vcombine.low %v287_v49, %v289_v51  ;;  %v347_v55 = vcombine.high %v287_v49, %v289_v51  ;;  %v290_v56 = vmax.f32 %v286_v52, 0.0 }
  0x18   :  { %v354_v57 = vsel %vm306_vm0, %v346_v54, 0.0  ;;  %v355_v58 = vsel %vm307_vm1, %v347_v55, 0.0  ;;  %v348_v59 = vcombine.low %v288_v53, %v290_v56  ;;  %v349_v60 = vcombine.high %v288_v53, %v290_v56 }
  0x19   :  { %452 = vst [vmem:[%s562_s2 + $0x40] sm:$0xff] %v354_v57  ;;  %453 = vst [vmem:[%s562_s2 + $0x48] sm:$0xff] %v355_v58 }
  0x1a   :  { %v356_v61 = vsel %vm308_vm2, %v348_v59, 0.0  ;;  %v357_v62 = vsel %vm309_vm3, %v349_v60, 0.0 }
  0x1b   :  { %454 = vst [vmem:[%s562_s2 + $0x50] sm:$0xff] %v356_v61  ;;  %455 = vst [vmem:[%s562_s2 + $0x58] sm:$0xff] %v357_v62 }

</bundles_post_ra>
